<compile_context>
chip_gen: v7x
topology: tpu7x:2x2x1
jax: 0.10.0
libtpu: 0.0.40
codegen_flags: <defaults>
</compile_context>

<pallas_src>
import math
import jax
import jax.numpy as jnp
from jax.experimental import pallas as pl
from jax.experimental.pallas import tpu as pltpu


_SUBLANE = 16   # bf16 sublane packing for the M (second-minor) axis
_LANE = 128     # lane width for K / N axes


def _round_up(a: int, m: int) -> int:
    return (a + m - 1) // m * m


def _tpu_vmem_capacity():
    """Physical VMEM bytes per core, or None if it cannot be queried."""
    try:
        return int(pltpu.get_tpu_info().vmem_capacity_bytes)
    except Exception:
        return None


def _tile_targets():
    """(tm, tn, tk) targets, VMEM tile budget, and a small-VMEM flag."""
    vmem = _tpu_vmem_capacity()
    if vmem is not None and vmem >= 100 * (1 << 20):
        # v5e / v6e: 128 MiB physical VMEM. 1024x2048 output tiles give
        # ~683 FLOP/B arithmetic intensity (v6e MXU-roofline territory).
        return 1024, 2048, 2048, 80 * (1 << 20), False
    # v7x (64 MiB physical) or unknown: 512x1024 tiles give ~341 FLOP/B,
    # above the ~310 FLOP/B v7x threshold, with a ~16 MiB footprint.
    return 512, 1024, 2048, 40 * (1 << 20), True


def _footprint_bytes(tm: int, tn: int, tk: int) -> int:
    # x tiles (bf16, double-buffered) + w tiles (bf16, double-buffered)
    # + resident f32 output tile (double-buffered) + bias tile.
    return (2 * tm * tk * 2) + (2 * tk * tn * 2) + (2 * tm * tn * 4) + (2 * tn * 4)


def _ff_kernel(x_ref, w_ref, b_ref, o_ref):
    k = pl.program_id(2)

    @pl.when(k == 0)
    def _():
        o_ref[...] = jnp.zeros_like(o_ref)

    # Pure MXU work: bf16 operands, f32 accumulation directly into the
    # resident f32 output tile (no separate accumulator scratch).
    o_ref[...] += jnp.dot(
        x_ref[...], w_ref[...], preferred_element_type=jnp.float32
    )

    @pl.when(k == pl.num_programs(2) - 1)
    def _():
        # Bias + ReLU epilogue, once per (i, j) output tile, in f32.
        o_ref[...] = jnp.maximum(o_ref[...] + b_ref[...], 0.0)


def make_feedforward_layer(w, b, *, tm=None, tn=None, tk=None):
    """Build apply(x) = ReLU(x @ w.T + b).

    w: (N, K) float  -- nn.Linear weight layout (output_size, input_size)
    b: (N,)   float
    The weight/bias are padded and cast to bf16 once, here, so repeated
    apply() calls do not re-stream W through HBM for the cast.
    """
    N, K = w.shape
    assert b.shape == (N,)

    tm_t, tn_t, tk_t, budget, small_vmem = _tile_targets()

    tm_cap = tm if tm is not None else tm_t
    tn_sel = tn if tn is not None else min(tn_t, _round_up(N, _LANE))
    tk_sel = tk if tk is not None else min(tk_t, _round_up(K, _LANE))

    # Shrink tiles if the (worst-case tm) footprint exceeds the VMEM budget.
    if tk is None:
        while _footprint_bytes(tm_cap, tn_sel, tk_sel) > budget and tk_sel > 512:
            tk_sel = max(_LANE, _round_up(tk_sel // 2, _LANE))
    if tn is None:
        while _footprint_bytes(tm_cap, tn_sel, tk_sel) > budget and tn_sel > 256:
            tn_sel = max(_LANE, _round_up(tn_sel // 2, _LANE))

    # v7x has 2 TensorCores; for small-batch calls (single i-tile) make sure
    # there are >= 2 j-tiles so the second core is not idle.
    if (
        small_vmem
        and tn is None
        and _round_up(N, _LANE) > _LANE
        and _round_up(N, tn_sel) == tn_sel
    ):
        tn_sel = max(_LANE, _round_up(tn_sel // 2, _LANE))

    Kp = _round_up(K, tk_sel)
    Np = _round_up(N, tn_sel)

    # Pre-pad + pre-cast the static parameters ONCE (hoisted out of apply()).
    w_t = jnp.asarray(w, jnp.float32).T                       # (K, N)
    wp = jnp.pad(w_t, ((0, Kp - K), (0, Np - N))).astype(jnp.bfloat16)
    bp = jnp.pad(jnp.asarray(b, jnp.float32), (0, Np - N)).reshape(1, Np)
    wp = jax.block_until_ready(wp)
    bp = jax.block_until_ready(bp)

    vmem_cap = (48 if small_vmem else 100) * (1 << 20)

    def apply(x):
        M, Kx = x.shape
        assert Kx == K

        # Small-batch regime: single i-tile (tm = round_up(M, 16)) so each
        # weight tile is streamed exactly once; large M uses the capped tile.
        tm_sel = min(tm_cap, _round_up(M, _SUBLANE))
        Mp = _round_up(M, tm_sel)

        xp = x.astype(jnp.bfloat16)
        if (Mp, Kp) != (M, K):
            xp = jnp.pad(xp, ((0, Mp - M), (0, Kp - K)))

        grid = (Mp // tm_sel, Np // tn_sel, Kp // tk_sel)

        fp = _footprint_bytes(tm_sel, tn_sel, tk_sel)
        vmem_limit = int(min(vmem_cap, max(fp * 5 // 4, 32 * (1 << 20))))

        cost = pl.CostEstimate(
            flops=2 * Mp * Np * Kp,
            transcendentals=0,
            bytes_accessed=2 * (Mp * Kp + Kp * Np) + 4 * (Mp * Np + Np),
        )

        out_p = pl.pallas_call(
            _ff_kernel,
            out_shape=jax.ShapeDtypeStruct((Mp, Np), jnp.float32),
            grid_spec=pltpu.PrefetchScalarGridSpec(
                num_scalar_prefetch=0,
                grid=grid,
                in_specs=[
                    pl.BlockSpec((tm_sel, tk_sel), lambda i, j, k: (i, k)),  # x
                    pl.BlockSpec((tk_sel, tn_sel), lambda i, j, k: (k, j)),  # W^T
                    pl.BlockSpec((1, tn_sel), lambda i, j, k: (0, j)),       # bias
                ],
                out_specs=pl.BlockSpec((tm_sel, tn_sel), lambda i, j, k: (i, j)),
            ),
            compiler_params=pltpu.CompilerParams(
                dimension_semantics=("parallel", "parallel", "arbitrary"),
                vmem_limit_bytes=vmem_limit,
            ),
            cost_estimate=cost,
        )(xp, wp, bp)

        out = out_p
        if (Mp, Np) != (M, N):
            out = out[:M, :N]
        return out.astype(x.dtype)

    return apply


def feedforward_layer(x, w, b, **kwargs):
    """One-shot convenience wrapper. For repeated calls, prefer
    make_feedforward_layer(w, b) so the weight pad/cast happens once."""
    return make_feedforward_layer(w, b, **kwargs)(x)


if __name__ == "__main__":
    # Small shapes consistent with the module: a batch of feature vectors.
    batch, input_size, output_size = 8, 32, 64

    key = jax.random.PRNGKey(0)
    kx, kw, kb = jax.random.split(key, 3)

    # Deterministic parameter init mirroring nn.Linear's uniform(-1/sqrt(K), 1/sqrt(K)).
    bound = 1.0 / math.sqrt(input_size)
    w = jax.random.uniform(kw, (output_size, input_size), jnp.float32, -bound, bound)
    b = jax.random.uniform(kb, (output_size,), jnp.float32, -bound, bound)
    x = jax.random.normal(kx, (batch, input_size), jnp.float32)

    layer = make_feedforward_layer(w, b)
    out = layer(x)
    out = jax.block_until_ready(out)
    assert out.shape == (batch, output_size)
    assert out.dtype == x.dtype

    # Reference in plain JAX, using the same bf16-cast operands the kernel
    # sees (f32 accumulation) so tolerances can stay tight.
    x_bf = x.astype(jnp.bfloat16).astype(jnp.float32)
    w_bf = w.astype(jnp.bfloat16).astype(jnp.float32)
    ref_bf = jnp.maximum(x_bf @ w_bf.T + b, 0.0)
    assert jnp.allclose(out, ref_bf, atol=1e-3, rtol=1e-3)

    # Sanity vs. full-precision reference (loose tolerance for the bf16 cast).
    ref_f32 = jnp.maximum(x @ w.T + b, 0.0)
    assert jnp.allclose(out, ref_f32, atol=5e-2, rtol=5e-2)

    print("KERNEL_OK")
</pallas_src>

<mosaic_0001>
module attributes {stable_mosaic.version = 11 : i64} {
  func.func @_ff_kernel(%arg0: i32, %arg1: i32, %arg2: i32, %arg3: memref<16x128xbf16, #tpu.memory_space<vmem>>, %arg4: memref<128x128xbf16, #tpu.memory_space<vmem>>, %arg5: memref<1x128xf32, #tpu.memory_space<vmem>>, %arg6: memref<16x128xf32, #tpu.memory_space<vmem>>) attributes {dimension_semantics = [#tpu.dimension_semantics<parallel>, #tpu.dimension_semantics<parallel>, #tpu.dimension_semantics<arbitrary>], iteration_bounds = array<i64: 1, 1, 1>, scalar_prefetch = 0 : i64, scratch_operands = 0 : i64, tpu.core_type = #tpu.core_type<tc>, window_params = [{transform_indices = @transform_0, window_bounds = array<i64: 16, 128>}, {transform_indices = @transform_1, window_bounds = array<i64: 128, 128>}, {transform_indices = @transform_2, window_bounds = array<i64: 1, 128>}, {transform_indices = @transform_3, window_bounds = array<i64: 16, 128>}]} {
    %c0_i32 = arith.constant 0 : i32
    %0 = arith.cmpi eq, %arg2, %c0_i32 : i32
    %1 = arith.extui %0 : i1 to i32
    %c0_i32_0 = arith.constant 0 : i32
    %2 = arith.cmpi ne, %1, %c0_i32_0 : i32
    scf.if %2 {
      %cst_10 = arith.constant 0.000000e+00 : f32
      %12 = vector.broadcast %cst_10 : f32 to vector<16x128xf32>
      %c0_11 = arith.constant 0 : index
      %c0_12 = arith.constant 0 : index
      %13 = vector.load %arg6[%c0_11, %c0_12] : memref<16x128xf32, #tpu.memory_space<vmem>>, vector<16x128xf32>
      tpu.vector_store %arg6[%c0_11, %c0_12], %12 {strides = array<i32>} : memref<16x128xf32, #tpu.memory_space<vmem>>, vector<16x128xf32>,
    } else {
    }
    %c0 = arith.constant 0 : index
    %c0_1 = arith.constant 0 : index
    %3 = vector.load %arg6[%c0, %c0_1] : memref<16x128xf32, #tpu.memory_space<vmem>>, vector<16x128xf32>
    %c0_2 = arith.constant 0 : index
    %c0_3 = arith.constant 0 : index
    %4 = vector.load %arg3[%c0_2, %c0_3] : memref<16x128xbf16, #tpu.memory_space<vmem>>, vector<16x128xbf16>
    %c0_4 = arith.constant 0 : index
    %c0_5 = arith.constant 0 : index
    %5 = vector.load %arg4[%c0_4, %c0_5] : memref<128x128xbf16, #tpu.memory_space<vmem>>, vector<128x128xbf16>
    %cst = arith.constant dense<0.000000e+00> : vector<16x128xf32>
    %6 = tpu.matmul %4, %5, %cst {dimension_numbers = #tpu.dot_dimension_numbers<[1], [0], [0], [1], [0, 0, 1, 1], [], []>} : vector<16x128xbf16>, vector<128x128xbf16>, vector<16x128xf32> -> vector<16x128xf32>
    %7 = arith.addf %3, %6 : vector<16x128xf32>
    %c0_6 = arith.constant 0 : index
    %c0_7 = arith.constant 0 : index
    %8 = vector.load %arg6[%c0_6, %c0_7] : memref<16x128xf32, #tpu.memory_space<vmem>>, vector<16x128xf32>
    tpu.vector_store %arg6[%c0_6, %c0_7], %7 {strides = array<i32>} : memref<16x128xf32, #tpu.memory_space<vmem>>, vector<16x128xf32>,
    %c0_i32_8 = arith.constant 0 : i32
    %9 = arith.cmpi eq, %arg2, %c0_i32_8 : i32
    %10 = arith.extui %9 : i1 to i32
    %c0_i32_9 = arith.constant 0 : i32
    %11 = arith.cmpi ne, %10, %c0_i32_9 : i32
    scf.if %11 {
      %c0_10 = arith.constant 0 : index
      %c0_11 = arith.constant 0 : index
      %12 = vector.load %arg6[%c0_10, %c0_11] : memref<16x128xf32, #tpu.memory_space<vmem>>, vector<16x128xf32>
      %c0_12 = arith.constant 0 : index
      %c0_13 = arith.constant 0 : index
      %13 = vector.load %arg5[%c0_12, %c0_13] : memref<1x128xf32, #tpu.memory_space<vmem>>, vector<1x128xf32>
      %14 = vector.broadcast %13 : vector<1x128xf32> to vector<16x128xf32>
      %15 = arith.addf %12, %14 : vector<16x128xf32>
      %cst_14 = arith.constant 0.000000e+00 : f32
      %16 = vector.broadcast %cst_14 : f32 to vector<16x128xf32>
      %17 = arith.maximumf %15, %16 : vector<16x128xf32>
      %c0_15 = arith.constant 0 : index
      %c0_16 = arith.constant 0 : index
      %18 = vector.load %arg6[%c0_15, %c0_16] : memref<16x128xf32, #tpu.memory_space<vmem>>, vector<16x128xf32>
      tpu.vector_store %arg6[%c0_15, %c0_16], %17 {strides = array<i32>} : memref<16x128xf32, #tpu.memory_space<vmem>>, vector<16x128xf32>,
    } else {
    }
    return
  }
  func.func @transform_0(%arg0: i32, %arg1: i32, %arg2: i32) -> (i32, i32) {
    %c0_i32 = arith.constant 0 : i32
    return %arg0, %arg2 : i32, i32
  }
  func.func @transform_1(%arg0: i32, %arg1: i32, %arg2: i32) -> (i32, i32) {
    %c0_i32 = arith.constant 0 : i32
    return %arg2, %arg1 : i32, i32
  }
  func.func @transform_2(%arg0: i32, %arg1: i32, %arg2: i32) -> (i32, i32) {
    %c0_i32 = arith.constant 0 : i32
    %c0_i32_0 = arith.constant 0 : i32
    return %c0_i32, %arg1 : i32, i32
  }
  func.func @transform_3(%arg0: i32, %arg1: i32, %arg2: i32) -> (i32, i32) {
    %c0_i32 = arith.constant 0 : i32
    return %arg0, %arg1 : i32, i32
  }
}

</mosaic_0001>

<bundles_post_ra>
// kernel: tpu_custom_call.1
= control target key start
LH: loop header
LB: loop body
LE: loop exit
PB: predicated region body
PF: predicated region fallthrough
CT: control target
= control target key end

     0   :  { %8 = vsyncpa [#allocation3], 0  ;;  %s402_s0 = inlined_call_operand.hbm [shape: bf16[16,128], index: 0, kind: input, shape index: {}]   ;;  %s403_s1 = inlined_call_operand.hbm [shape: bf16[128,128], index: 1, kind: input, shape index: {}]   ;;  %s404_s2 = inlined_call_operand.vmem [shape: f32[1,128], index: 2, kind: input, shape index: {}]   ;;  %s405_s3 = inlined_call_operand.hbm [shape: f32[16,128], index: 3, kind: output, shape index: {}]  }
   0x1   :  { %9 = vsyncpa [#allocation6], 0 }
   0x2   :  { %10 = vsyncpa [#allocation4], 0  ;;  %s334_s12 = smov [#allocation2]   ;;  %s262_s16 = scalar_lea.hbm %s402_s0, 128 }
   0x3   :  { %s16_s13 = sshll.u32 %s334_s12, 4  ;;  %p263_p0 = scmp.ne.s32.totalorder %s402_s0, %s262_s16  ;;  %s17_s13 = int_to_ptr.vmem [resolvable:$true] %s16_s13 }
   0x4   :  { %p266_p1 = scmp.lt.u32.totalorder %s262_s16, %s402_s0 }
   0x6   :  { %p268_p2 = pnand %p266_p1, %p263_p0 }
   0x8   :  { %271 = shalt.err (!%p268_p2)
}
   0x9   :  { %s272_s21 = scalar_lea.vmem %s17_s13, 128  ;;  %p277_p4 = scmp.lt.s32.totalorder %s17_s13, %s17_s13 }
   0xa   :  { %p273_p3 = scmp.ne.s32.totalorder %s17_s13, %s272_s21  ;;  %p278_p5 = scmp.lt.s32.totalorder %s272_s21, %s272_s21 }
   0xc   :  { %p279_p6 = por %p278_p5, %p277_p4 }
   0xe   :  { %p280_p7 = pnand %p279_p6, %p273_p3 }
  0x10   :  { %283 = shalt.err (!%p280_p7)
}
  0x11   :  { %s335_s22 = smov 64   ;;  %s336_s23 = smov 4  }
  0x12   :  { %22 = dma.hbm_to_vmem [thread:$0]  %s402_s0, 128, %s17_s13, [#allocation3], %s335_s22, %s335_s22, %s336_s23  }
  0x13   :  { %s337_s26 = smov [#allocation5]   ;;  %s284_s30 = scalar_lea.hbm %s403_s1, 1024 }
  0x14   :  { %s28_s27 = sshll.u32 %s337_s26, 4  ;;  %p285_p8 = scmp.ne.s32.totalorder %s403_s1, %s284_s30  ;;  %s29_s27 = int_to_ptr.vmem [resolvable:$true] %s28_s27 }
  0x15   :  { %p288_p9 = scmp.lt.u32.totalorder %s284_s30, %s403_s1 }
  0x17   :  { %p290_p10 = pnand %p288_p9, %p285_p8 }
  0x19   :  { %293 = shalt.err (!%p290_p10)
}
  0x1a   :  { %s294_s8 = scalar_lea.vmem %s29_s27, 1024  ;;  %p299_p12 = scmp.lt.s32.totalorder %s29_s27, %s29_s27 }
  0x1b   :  { %p295_p11 = scmp.ne.s32.totalorder %s29_s27, %s294_s8  ;;  %p300_p13 = scmp.lt.s32.totalorder %s294_s8, %s294_s8 }
  0x1d   :  { %p301_p0 = por %p300_p13, %p299_p12 }
  0x1f   :  { %p302_p1 = pnand %p301_p0, %p295_p11 }
  0x21   :  { %305 = shalt.err (!%p302_p1)
}
  0x22   :  { %34 = dma.hbm_to_vmem [thread:$0]  %s403_s1, 1024, %s29_s27, [#allocation6], %s335_s22, %s335_s22, %s336_s23  }
  0x23   :  { %328 = dma.done.wait [#allocation3], 128  }
  0x24   :  { %329 = vsyncadd [#allocation3], 4294967168 }
  0x25   :  { %330 = dma.done.wait [#allocation6], 1024  }
  0x26   :  { %331 = vsyncadd [#allocation6], 4294966272  ;;  %v338_v0 = vmov 0.0   ;;  %vm339_vm0 = vmmov 0   ;;  %v253_v1 = vld [vmem:[#allocation5] sm:$0xff]   ;;  %v254_v2 = vld [vmem:[#allocation5 + $0x8] sm:$0xff]  }
  0x27   :  { %224 = vmatprep.subr.bf16.mxu0 %v338_v0  ;;  %240 = vmatprep.mubr.msk.bf16.mxu0 %vm339_vm0, %v338_v0  ;;  %v255_v3 = vld [vmem:[#allocation5 + $0x10] sm:$0xff]   ;;  %v256_v4 = vld [vmem:[#allocation5 + $0x18] sm:$0xff]   ;;  %v257_v5 = vld [vmem:[#allocation5 + $0x20] sm:$0xff]   ;;  %s340_s11 = smov [#allocation7]  }
  0x28   :  { %225 = vmatpush3.bf16.msra.mxu0 %v253_v1  ;;  %v258_v6 = vld [vmem:[#allocation5 + $0x28] sm:$0xff]   ;;  %v259_v7 = vld [vmem:[#allocation5 + $0x30] sm:$0xff]   ;;  %v260_v8 = vld [vmem:[#allocation5 + $0x38] sm:$0xff]   ;;  %s192_s12 = sshll.u32 %s340_s11, 4  ;;  %s193_s12 = int_to_ptr.vmem [resolvable:$true] %s192_s12 }
  0x29   :  { %226 = vmatprep.subr.bf16.mxu0 %v338_v0  ;;  %v261_v9 = vld [vmem:[#allocation2] sm:$0xff]   ;;  %s306_s13 = scalar_lea.vmem %s193_s12, 256  ;;  %p311_p3 = scmp.lt.s32.totalorder %s193_s12, %s193_s12 }
  0x2a   :  { %v214_v11 = vld [vmem:[%s404_s2] ss:$0 sm:$0xff]  ;;  %p307_p2 = scmp.ne.s32.totalorder %s193_s12, %s306_s13  ;;  %p312_p4 = scmp.lt.s32.totalorder %s306_s13, %s306_s13 }
  0x2c   :  { %227 = vmatpush3.bf16.msra.mxu0 %v254_v2  ;;  %p313_p5 = por %p312_p4, %p311_p3 }
  0x2d   :  { %228 = vmatprep.subr.bf16.mxu0 %v338_v0 }
  0x2e   :  { %p314_p6 = pnand %p313_p5, %p307_p2 }
  0x30   :  { %229 = vmatpush3.bf16.msra.mxu0 %v255_v3 }
  0x31   :  { %230 = vmatprep.subr.bf16.mxu0 %v338_v0 }
  0x34   :  { %231 = vmatpush3.bf16.msra.mxu0 %v256_v4 }
  0x35   :  { %232 = vmatprep.subr.bf16.mxu0 %v338_v0 }
  0x38   :  { %233 = vmatpush3.bf16.msra.mxu0 %v257_v5 }
  0x39   :  { %234 = vmatprep.subr.bf16.mxu0 %v338_v0 }
  0x3c   :  { %235 = vmatpush3.bf16.msra.mxu0 %v258_v6 }
  0x3d   :  { %236 = vmatprep.subr.bf16.mxu0 %v338_v0 }
  0x40   :  { %237 = vmatpush3.bf16.msra.mxu0 %v259_v7 }
  0x41   :  { %238 = vmatprep.subr.bf16.mxu0 %v338_v0 }
  0x44   :  { %239 = vmatpush3.bf16.msra.mxu0 %v260_v8 }
  0x47   :  { %241 = vmatmul.mubr.bf16.vlgmr.msra.gmra.mrb[0].mxu0 %v261_v9 }
 0x11a   :  { %v158_v10 = vpop.f32.mrb[0].mxu0 }
 0x11b   :  { %v242_v12 = vpop.f32.mrb[1].mxu0  ;;  %v181_v15 = vadd.f32 %v214_v11, %v158_v10 }
 0x11c   :  { %v161_v13 = vpop.f32.mrb[2].mxu0 }
 0x11d   :  { %v243_v14 = vpop.f32.mrb[3].mxu0  ;;  %v182_v16 = vadd.f32 %v214_v11, %v161_v13  ;;  %v183_v17 = vmax.f32 %v181_v15, 0.0 }
 0x11f   :  { %v184_v18 = vmax.f32 %v182_v16, 0.0  ;;  %185 = vst [vmem:[#allocation7] sm:$0xff] %v183_v17 }
 0x121   :  { %186 = vst [vmem:[#allocation7 + $0x8] sm:$0xff] %v184_v18 }
 0x122   :  { %317 = shalt.err (!%p314_p6)
}
 0x123   :  { %s318_s15 = scalar_lea.hbm %s405_s3, 256 }
 0x124   :  { %p319_p7 = scmp.ne.s32.totalorder %s405_s3, %s318_s15  ;;  %p322_p8 = scmp.lt.u32.totalorder %s318_s15, %s405_s3 }
 0x126   :  { %p324_p9 = pnand %p322_p8, %p319_p7 }
 0x128   :  { %327 = shalt.err (!%p324_p9)
}
 0x129   :  { %s341_s20 = smov 128   ;;  %s342_s21 = smov 8  }
 0x12a   :  { %198 = dma.vmem_to_hbm [thread:$0]  %s193_s12, 256, %s405_s3, [#allocation4], %s341_s20, %s341_s20, %s342_s21  }
 0x12b   :  { %332 = dma.done.wait [#allocation4], 256  }
 0x12c   :  { %333 = vsyncadd [#allocation4], 4294967040 }
 0x12d   :  { %202 = vsyncpa [#allocation3], 1 }
 0x12e   :  { %203 = vsyncpa [#allocation6], 1 }
 0x12f   :  { %204 = vsyncpa [#allocation4], 1 }

</bundles_post_ra>
